<compile_context>
chip_gen: v7x
topology: tpu7x:2x2x1
jax: 0.10.0
libtpu: 0.0.40
codegen_flags: <defaults>
</compile_context>

<pallas_src>
import functools

import jax
import jax.numpy as jnp
from jax.experimental import pallas as pl
from jax.experimental.pallas import tpu as pltpu

LANE = 128
SUBLANE = 8
_VMEM_BUDGET = 24 * 1024 * 1024   # live double-buffered blocks budget (v7x-safe)


def _round_up(x, m):
    return ((x + m - 1) // m) * m


def _pad2d(a, rows, cols):
    return jnp.pad(a, ((0, rows - a.shape[0]), (0, cols - a.shape[1])))


# ---------------------------------------------------------------------------
# Kernels
# ---------------------------------------------------------------------------
def _xw_kernel(x_ref, w_ref, o_ref):
    # x_ref: (TM, Fin_p) row tile of node features; w_ref: (Fin_p, Fout_p) resident.
    o_ref[...] = jnp.dot(x_ref[...], w_ref[...], preferred_element_type=jnp.float32)


def _agg_kernel(adj_ref, h_ref, b_ref, o_ref, *, apply_relu):
    # adj_ref: (TM, N_p) row tile of normalized adjacency (dst rows, src cols)
    # h_ref:   (N_p, Fout_p) transformed features, resident across the grid
    # b_ref:   (1, Fout_p) bias
    out = jnp.dot(adj_ref[...], h_ref[...], preferred_element_type=jnp.float32)
    out = out + b_ref[...]
    if apply_relu:
        out = jnp.maximum(out, 0.0)
    o_ref[...] = out


# ---------------------------------------------------------------------------
# Wrappers (tiling, padding, pallas_call)
# ---------------------------------------------------------------------------
def _choose_tm(n, n_cols_p, fout_p):
    # Largest TM (power-of-two <= 512, multiple of 8) whose double-buffered
    # adjacency/output row blocks plus the resident h fit the VMEM budget.
    tm = 512
    while tm > SUBLANE:
        need = 8 * (tm * (n_cols_p + fout_p) + n_cols_p * fout_p)
        if need <= _VMEM_BUDGET:
            break
        tm //= 2
    return max(min(tm, _round_up(n, SUBLANE)), SUBLANE)


def _vmem_limit(nbytes):
    return int(min(max(nbytes, 8 << 20), 48 << 20))


def _feature_transform(x_p, w_p, tm):
    n_p, fin_p = x_p.shape
    fout_p = w_p.shape[1]
    vmem = _vmem_limit(8 * (tm * fin_p + fin_p * fout_p + tm * fout_p) + (2 << 20))
    return pl.pallas_call(
        _xw_kernel,
        out_shape=jax.ShapeDtypeStruct((n_p, fout_p), jnp.float32),
        grid_spec=pltpu.PrefetchScalarGridSpec(
            num_scalar_prefetch=0,
            grid=(n_p // tm,),
            in_specs=[
                pl.BlockSpec((tm, fin_p), lambda i: (i, 0)),       # streamed rows
                pl.BlockSpec((fin_p, fout_p), lambda i: (0, 0)),   # resident weights
            ],
            out_specs=pl.BlockSpec((tm, fout_p), lambda i: (i, 0)),
        ),
        compiler_params=pltpu.CompilerParams(
            dimension_semantics=("parallel",), vmem_limit_bytes=vmem),
    )(x_p, w_p)


def _aggregate(adj_p, h_p, b_p, tm, apply_relu):
    n_p = adj_p.shape[0]
    fout_p = h_p.shape[1]
    vmem = _vmem_limit(
        8 * (tm * n_p + n_p * fout_p + fout_p + tm * fout_p) + (2 << 20))
    kernel = functools.partial(_agg_kernel, apply_relu=apply_relu)
    return pl.pallas_call(
        kernel,
        out_shape=jax.ShapeDtypeStruct((n_p, fout_p), jnp.float32),
        grid_spec=pltpu.PrefetchScalarGridSpec(
            num_scalar_prefetch=0,
            grid=(n_p // tm,),
            in_specs=[
                pl.BlockSpec((tm, n_p), lambda i: (i, 0)),         # streamed adj rows
                pl.BlockSpec((n_p, fout_p), lambda i: (0, 0)),     # resident h
                pl.BlockSpec((1, fout_p), lambda i: (0, 0)),       # resident bias
            ],
            out_specs=pl.BlockSpec((tm, fout_p), lambda i: (i, 0)),
        ),
        compiler_params=pltpu.CompilerParams(
            dimension_semantics=("parallel",), vmem_limit_bytes=vmem),
    )(adj_p, h_p, b_p)


def gcn_forward(x, adj_norm, params):
    n, fin = x.shape
    hidden = params["w1"].shape[1]
    num_classes = params["w2"].shape[1]

    fin_p = _round_up(fin, LANE)
    hid_p = _round_up(hidden, LANE)
    cls_p = _round_up(num_classes, LANE)

    tm = _choose_tm(n, _round_up(n, LANE), max(hid_p, cls_p))
    n_p = _round_up(n, tm)

    x_p = _pad2d(x.astype(jnp.float32), n_p, fin_p)
    adj_p = _pad2d(adj_norm.astype(jnp.float32), n_p, n_p)
    w1_p = _pad2d(params["w1"], fin_p, hid_p)
    b1_p = _pad2d(params["b1"].reshape(1, -1), 1, hid_p)
    w2_p = _pad2d(params["w2"], hid_p, cls_p)
    b2_p = _pad2d(params["b2"].reshape(1, -1), 1, cls_p)

    # Layer 1: relu(Â (X W1) + b1).  F.dropout(training=False) is identity.
    h = _feature_transform(x_p, w1_p, tm)
    h = _aggregate(adj_p, h, b1_p, tm, apply_relu=True)
    # Layer 2: Â (h W2) + b2
    h2 = _feature_transform(h, w2_p, tm)
    out_p = _aggregate(adj_p, h2, b2_p, tm, apply_relu=False)

    return out_p[:n, :num_classes]


# ---------------------------------------------------------------------------
# Graph / parameter construction (pure JAX, outside the kernels)
# ---------------------------------------------------------------------------
def build_norm_adj(edge_index, num_nodes):
    # Â = D^{-1/2} (A + I) D^{-1/2}  (PyG GCNConv: add_self_loops=True, sym norm).
    # Duplicate edges collapse to weight 1 (edges here are unique).
    src, dst = edge_index
    a = jnp.zeros((num_nodes, num_nodes), jnp.float32)
    a = a.at[dst, src].set(1.0)
    diag = jnp.arange(num_nodes)
    a = a.at[diag, diag].set(1.0)
    deg = jnp.sum(a, axis=1)
    d_inv_sqrt = jnp.where(deg > 0.0, 1.0 / jnp.sqrt(deg), 0.0)
    return d_inv_sqrt[:, None] * a * d_inv_sqrt[None, :]


def init_params(key, num_features, hidden, num_classes):
    k1, k2 = jax.random.split(key)
    s1 = 1.0 / jnp.sqrt(jnp.float32(num_features))
    s2 = 1.0 / jnp.sqrt(jnp.float32(hidden))
    return {
        "w1": jax.random.normal(k1, (num_features, hidden), jnp.float32) * s1,
        "b1": jnp.zeros((hidden,), jnp.float32),
        "w2": jax.random.normal(k2, (hidden, num_classes), jnp.float32) * s2,
        "b2": jnp.zeros((num_classes,), jnp.float32),
    }


def gcn_reference(x, adj_norm, params):
    h = jnp.maximum(adj_norm @ (x @ params["w1"]) + params["b1"], 0.0)
    return adj_norm @ (h @ params["w2"]) + params["b2"]


if __name__ == "__main__":
    # Small synthetic graph: N=16 nodes, 8 features, hidden=32, 4 classes.
    N, num_features, hidden, num_classes = 16, 8, 32, 4

    key = jax.random.PRNGKey(0)
    k_x, k_p = jax.random.split(key)

    x = jax.random.normal(k_x, (N, num_features), jnp.float32)

    # Deterministic ring-ish edge list (both directions): (i, i+1) and (i, i+3).
    idx = jnp.arange(N)
    src = jnp.concatenate([idx, (idx + 1) % N, idx, (idx + 3) % N])
    dst = jnp.concatenate([(idx + 1) % N, idx, (idx + 3) % N, idx])
    edge_index = jnp.stack([src, dst])               # (2, 64)

    adj_norm = build_norm_adj(edge_index, N)
    params = init_params(k_p, num_features, hidden, num_classes)

    out = gcn_forward(x, adj_norm, params)
    out = jax.block_until_ready(out)

    ref = gcn_reference(x, adj_norm, params)
    assert out.shape == (N, num_classes)
    assert bool(jnp.all(jnp.isfinite(out)))
    assert bool(jnp.allclose(out, ref, atol=1e-4, rtol=1e-4))
    print("KERNEL_OK")
</pallas_src>

<mosaic_0001>
module attributes {stable_mosaic.version = 11 : i64} {
  func.func @_xw_kernel(%arg0: i32, %arg1: memref<16x128xf32, #tpu.memory_space<vmem>>, %arg2: memref<128x128xf32, #tpu.memory_space<vmem>>, %arg3: memref<16x128xf32, #tpu.memory_space<vmem>>) attributes {dimension_semantics = [#tpu.dimension_semantics<parallel>], iteration_bounds = array<i64: 1>, scalar_prefetch = 0 : i64, scratch_operands = 0 : i64, tpu.core_type = #tpu.core_type<tc>, window_params = [{transform_indices = @transform_0, window_bounds = array<i64: 16, 128>}, {pipeline_mode = #tpu.pipeline_mode<synchronous>, transform_indices = @transform_1, window_bounds = array<i64: 128, 128>}, {transform_indices = @transform_2, window_bounds = array<i64: 16, 128>}]} {
    %c0 = arith.constant 0 : index
    %c0_0 = arith.constant 0 : index
    %0 = vector.load %arg1[%c0, %c0_0] : memref<16x128xf32, #tpu.memory_space<vmem>>, vector<16x128xf32>
    %c0_1 = arith.constant 0 : index
    %c0_2 = arith.constant 0 : index
    %1 = vector.load %arg2[%c0_1, %c0_2] : memref<128x128xf32, #tpu.memory_space<vmem>>, vector<128x128xf32>
    %cst = arith.constant dense<0.000000e+00> : vector<16x128xf32>
    %2 = tpu.matmul %0, %1, %cst {dimension_numbers = #tpu.dot_dimension_numbers<[1], [0], [0], [1], [0, 0, 1, 1], [], []>} : vector<16x128xf32>, vector<128x128xf32>, vector<16x128xf32> -> vector<16x128xf32>
    %c0_3 = arith.constant 0 : index
    %c0_4 = arith.constant 0 : index
    %3 = vector.load %arg3[%c0_3, %c0_4] : memref<16x128xf32, #tpu.memory_space<vmem>>, vector<16x128xf32>
    tpu.vector_store %arg3[%c0_3, %c0_4], %2 {strides = array<i32>} : memref<16x128xf32, #tpu.memory_space<vmem>>, vector<16x128xf32>,
    return
  }
  func.func @transform_0(%arg0: i32) -> (i32, i32) {
    %c0_i32 = arith.constant 0 : i32
    %c0_i32_0 = arith.constant 0 : i32
    return %arg0, %c0_i32 : i32, i32
  }
  func.func @transform_1(%arg0: i32) -> (i32, i32) {
    %c0_i32 = arith.constant 0 : i32
    %c0_i32_0 = arith.constant 0 : i32
    %c0_i32_1 = arith.constant 0 : i32
    return %c0_i32, %c0_i32_0 : i32, i32
  }
  func.func @transform_2(%arg0: i32) -> (i32, i32) {
    %c0_i32 = arith.constant 0 : i32
    %c0_i32_0 = arith.constant 0 : i32
    return %arg0, %c0_i32 : i32, i32
  }
}

</mosaic_0001>

<bundles_post_ra>
// kernel: tpu_custom_call.1
= control target key start
LH: loop header
LB: loop body
LE: loop exit
PB: predicated region body
PF: predicated region fallthrough
CT: control target
= control target key end

     0   :  { %7 = vsyncpa [#allocation3], 0  ;;  %s380_s0 = inlined_call_operand.hbm [shape: f32[16,128], index: 0, kind: input, shape index: {}]   ;;  %s381_s1 = inlined_call_operand.hbm [shape: f32[128,128], index: 1, kind: input, shape index: {}]   ;;  %s382_s2 = inlined_call_operand.hbm [shape: f32[16,128], index: 2, kind: output, shape index: {}]  }
   0x1   :  { %8 = vsyncpa [#allocation6], 0 }
   0x2   :  { %9 = vsyncpa [#allocation4], 0  ;;  %s315_s9 = smov [#allocation2]   ;;  %s243_s13 = scalar_lea.hbm %s380_s0, 256 }
   0x3   :  { %s15_s10 = sshll.u32 %s315_s9, 4  ;;  %p244_p0 = scmp.ne.s32.totalorder %s380_s0, %s243_s13  ;;  %s16_s10 = int_to_ptr.vmem [resolvable:$true] %s15_s10 }
   0x4   :  { %p247_p1 = scmp.lt.u32.totalorder %s243_s13, %s380_s0 }
   0x6   :  { %p249_p2 = pnand %p247_p1, %p244_p0 }
   0x8   :  { %252 = shalt.err (!%p249_p2)
}
   0x9   :  { %s253_s18 = scalar_lea.vmem %s16_s10, 256  ;;  %p258_p4 = scmp.lt.s32.totalorder %s16_s10, %s16_s10 }
   0xa   :  { %p254_p3 = scmp.ne.s32.totalorder %s16_s10, %s253_s18  ;;  %p259_p5 = scmp.lt.s32.totalorder %s253_s18, %s253_s18 }
   0xc   :  { %p260_p6 = por %p259_p5, %p258_p4 }
   0xe   :  { %p261_p7 = pnand %p260_p6, %p254_p3 }
  0x10   :  { %264 = shalt.err (!%p261_p7)
}
  0x11   :  { %s316_s19 = smov 128   ;;  %s317_s20 = smov 8  }
  0x12   :  { %21 = dma.hbm_to_vmem [thread:$0]  %s380_s0, 256, %s16_s10, [#allocation3], %s316_s19, %s316_s19, %s317_s20  }
  0x13   :  { %s318_s23 = smov [#allocation5]   ;;  %s265_s27 = scalar_lea.hbm %s381_s1, 2048 }
  0x14   :  { %s27_s24 = sshll.u32 %s318_s23, 4  ;;  %p266_p8 = scmp.ne.s32.totalorder %s381_s1, %s265_s27  ;;  %s28_s24 = int_to_ptr.vmem [resolvable:$true] %s27_s24 }
  0x15   :  { %p269_p9 = scmp.lt.u32.totalorder %s265_s27, %s381_s1 }
  0x17   :  { %p271_p10 = pnand %p269_p9, %p266_p8 }
  0x19   :  { %274 = shalt.err (!%p271_p10)
}
  0x1a   :  { %s275_s4 = scalar_lea.vmem %s28_s24, 2048  ;;  %p280_p12 = scmp.lt.s32.totalorder %s28_s24, %s28_s24 }
  0x1b   :  { %p276_p11 = scmp.ne.s32.totalorder %s28_s24, %s275_s4  ;;  %p281_p13 = scmp.lt.s32.totalorder %s275_s4, %s275_s4 }
  0x1d   :  { %p282_p0 = por %p281_p13, %p280_p12 }
  0x1f   :  { %p283_p1 = pnand %p282_p0, %p276_p11 }
  0x21   :  { %286 = shalt.err (!%p283_p1)
}
  0x22   :  { %33 = dma.hbm_to_vmem [thread:$0]  %s381_s1, 2048, %s28_s24, [#allocation6], %s316_s19, %s316_s19, %s317_s20  }
  0x23   :  { %309 = dma.done.wait [#allocation3], 256  }
  0x24   :  { %310 = vsyncadd [#allocation3], 4294967040 }
  0x25   :  { %311 = dma.done.wait [#allocation6], 2048  }
  0x26   :  { %312 = vsyncadd [#allocation6], 4294965248  ;;  %v42_v0 = vld [vmem:[#allocation5] sm:$0xff]  ;;  %v43_v1 = vld [vmem:[#allocation5 + $0x8] sm:$0xff]  ;;  %s319_s1 = smov [#allocation7]  }
  0x27   :  { %v44_v2 = vld [vmem:[#allocation5 + $0x10] sm:$0xff]  ;;  %v206_v3 = vpack.c.bf16 %v43_v1, %v42_v0  ;;  %v45_v4 = vld [vmem:[#allocation5 + $0x18] sm:$0xff]  ;;  %v46_v6 = vld [vmem:[#allocation5 + $0x20] sm:$0xff]  ;;  %s140_s6 = sshll.u32 %s319_s1, 4  ;;  %s141_s6 = int_to_ptr.vmem [resolvable:$true] %s140_s6 }
  0x28   :  { %v210_v5 = vpack.c.bf16 %v45_v4, %v44_v2  ;;  %v47_v7 = vld [vmem:[#allocation5 + $0x28] sm:$0xff]  ;;  %v40_v9 = vld [vmem:[#allocation2] sm:$0xff]  ;;  %v49_v11 = vld [vmem:[#allocation5 + $0x38] sm:$0xff]  ;;  %s287_s7 = scalar_lea.vmem %s141_s6, 256  ;;  %p292_p3 = scmp.lt.s32.totalorder %s141_s6, %s141_s6 }
  0x29   :  { %207 = vmatprep.subr.bf16.mxu0 %v206_v3  ;;  %v214_v8 = vpack.c.bf16 %v47_v7, %v46_v6  ;;  %v48_v10 = vld [vmem:[#allocation5 + $0x30] sm:$0xff]  ;;  %203 = vmatprep.mubr.f32.mxu0 %v40_v9  ;;  %v50_v13 = vld [vmem:[#allocation5 + $0x40] sm:$0xff]  ;;  %v51_v14 = vld [vmem:[#allocation5 + $0x48] sm:$0xff]  ;;  %p288_p2 = scmp.ne.s32.totalorder %s141_s6, %s287_s7  ;;  %p293_p4 = scmp.lt.s32.totalorder %s287_s7, %s287_s7 }
  0x2a   :  { %209 = vmatpush3.bf16.msra.mxu0 %v206_v3  ;;  %v218_v12 = vpack.c.bf16 %v49_v11, %v48_v10  ;;  %v222_v15 = vpack.c.bf16 %v51_v14, %v50_v13  ;;  %v52_v16 = vld [vmem:[#allocation5 + $0x50] sm:$0xff]  ;;  %v53_v17 = vld [vmem:[#allocation5 + $0x58] sm:$0xff]  ;;  %v54_v19 = vld [vmem:[#allocation5 + $0x60] sm:$0xff] }
  0x2b   :  { %211 = vmatprep.subr.bf16.mxu0 %v210_v5  ;;  %v226_v18 = vpack.c.bf16 %v53_v17, %v52_v16  ;;  %v55_v20 = vld [vmem:[#allocation5 + $0x68] sm:$0xff]  ;;  %v56_v22 = vld [vmem:[#allocation5 + $0x70] sm:$0xff]  ;;  %v57_v23 = vld [vmem:[#allocation5 + $0x78] sm:$0xff]  ;;  %p294_p5 = por %p293_p4, %p292_p3 }
  0x2c   :  { %v230_v21 = vpack.c.bf16 %v55_v20, %v54_v19  ;;  %v234_v24 = vpack.c.bf16 %v57_v23, %v56_v22  ;;  %v41_v25 = vld [vmem:[#allocation2 + $0x8] sm:$0xff] }
  0x2d   :  { %p295_p6 = pnand %p294_p5, %p288_p2 }
  0x2e   :  { %213 = vmatpush3.bf16.msra.mxu0 %v210_v5 }
  0x2f   :  { %215 = vmatprep.subr.bf16.mxu0 %v214_v8 }
  0x32   :  { %217 = vmatpush3.bf16.msra.mxu0 %v214_v8 }
  0x33   :  { %219 = vmatprep.subr.bf16.mxu0 %v218_v12 }
  0x36   :  { %221 = vmatpush3.bf16.msra.mxu0 %v218_v12 }
  0x37   :  { %223 = vmatprep.subr.bf16.mxu0 %v222_v15 }
  0x3a   :  { %225 = vmatpush3.bf16.msra.mxu0 %v222_v15 }
  0x3b   :  { %227 = vmatprep.subr.bf16.mxu0 %v226_v18 }
  0x3e   :  { %229 = vmatpush3.bf16.msra.mxu0 %v226_v18 }
  0x3f   :  { %231 = vmatprep.subr.bf16.mxu0 %v230_v21 }
  0x42   :  { %233 = vmatpush3.bf16.msra.mxu0 %v230_v21 }
  0x43   :  { %235 = vmatprep.subr.bf16.mxu0 %v234_v24 }
  0x46   :  { %237 = vmatpush3.bf16.msra.mxu0 %v234_v24 }
  0x49   :  { %204 = vmatmul.mubr.f32.vlgmr.msra.gmra.mrb[0].mxu0 %v41_v25 }
 0x11c   :  { %v205_v26 = vpop.f32.mrb[0].mxu0 }
 0x11d   :  { %134 = vst [vmem:[#allocation7 + $0x8] sm:$0xff] %v205_v26  ;;  %v124_v27 = vpop.f32.mrb[1].mxu0 }
 0x11e   :  { %133 = vst [vmem:[#allocation7] sm:$0xff] %v124_v27 }
 0x11f   :  { %298 = shalt.err (!%p295_p6)
}
 0x120   :  { %s299_s10 = scalar_lea.hbm %s382_s2, 256 }
 0x121   :  { %p300_p7 = scmp.ne.s32.totalorder %s382_s2, %s299_s10  ;;  %p303_p8 = scmp.lt.u32.totalorder %s299_s10, %s382_s2 }
 0x123   :  { %p305_p9 = pnand %p303_p8, %p300_p7 }
 0x125   :  { %308 = shalt.err (!%p305_p9)
}
 0x126   :  { %146 = dma.vmem_to_hbm [thread:$0]  %s141_s6, 256, %s382_s2, [#allocation4], %s316_s19, %s316_s19, %s317_s20  }
 0x127   :  { %313 = dma.done.wait [#allocation4], 256  }
 0x128   :  { %314 = vsyncadd [#allocation4], 4294967040 }
 0x129   :  { %150 = vsyncpa [#allocation3], 1 }
 0x12a   :  { %151 = vsyncpa [#allocation6], 1 }
 0x12b   :  { %152 = vsyncpa [#allocation4], 1 }

</bundles_post_ra>
